<compile_context>
chip_gen: v7x
topology: tpu7x:2x2x1
jax: 0.10.0
libtpu: 0.0.40
codegen_flags: <defaults>
</compile_context>

<pallas_src>
import jax
import jax.numpy as jnp
from jax.experimental import pallas as pl
from jax.experimental.pallas import tpu as pltpu


def _round_up(n, m):
    return ((n + m - 1) // m) * m


def _critic_kernel(s_ref, a_ref, w1s_ref, w1a_ref, b1_ref, w2_ref, b2_ref, q_ref):
    # Fused first layer for BOTH Q-heads:
    #   h = relu(state @ W1[:sd] + action @ W1[sd:] + b1)      -> (TILE_B, 2H)
    h = (jnp.dot(s_ref[...], w1s_ref[...], preferred_element_type=jnp.float32)
         + jnp.dot(a_ref[...], w1a_ref[...], preferred_element_type=jnp.float32)
         + b1_ref[...])
    h = jnp.maximum(h, 0.0)                                    # ReLU (VPU)

    # Block-diagonal second layer: col 0 = Q1, col 1 = Q2      -> (TILE_B, 2)
    q = jnp.dot(h, w2_ref[...], preferred_element_type=jnp.float32) + b2_ref[...]
    q_ref[...] = q.astype(q_ref.dtype)


def pack_critic_params(params, state_dim):
    """Fuse the two Q-heads' parameters once (outside the hot path).

    Returns (w1s, w1a, b1, w2, b2) with:
      w1s: (state_dim, 2H)   rows of fused W1 hit by `state`
      w1a: (action_dim, 2H)  rows of fused W1 hit by `action`
      b1 : (1, 2H)
      w2 : (2H, 2)           block-diagonal [[w2_q1, 0], [0, w2_q2]]
      b2 : (1, 2)
    """
    (w1_q1, b1_q1, w2_q1, b2_q1), (w1_q2, b1_q2, w2_q2, b2_q2) = params
    w1 = jnp.concatenate([w1_q1, w1_q2], axis=1)               # (D, 2H)
    b1 = jnp.concatenate([b1_q1, b1_q2], axis=1)               # (1, 2H)
    zeros = jnp.zeros_like(w2_q1)                              # (H, 1)
    w2 = jnp.concatenate(
        [jnp.concatenate([w2_q1, zeros], axis=1),
         jnp.concatenate([zeros, w2_q2], axis=1)], axis=0)     # (2H, 2)
    b2 = jnp.concatenate([b2_q1, b2_q2], axis=1)               # (1, 2)
    return (w1[:state_dim], w1[state_dim:], b1, w2, b2)


def critic_forward(state, action, packed_params, *, tile_b=512):
    """Pallas equivalent of Critic.forward(state, action) -> (q1, q2)."""
    w1s, w1a, b1, w2, b2 = packed_params
    state = state.astype(jnp.float32)
    action = action.astype(jnp.float32)

    B, sd = state.shape
    ad = action.shape[1]
    h2 = b1.shape[1]                                           # 2 * hidden_dim

    # Batch tiling: round tile to a multiple of 8 sublanes, pad B if needed.
    tb = min(tile_b, _round_up(B, 8))
    Bp = _round_up(B, tb)
    if Bp != B:
        state = jnp.pad(state, ((0, Bp - B), (0, 0)))
        action = jnp.pad(action, ((0, Bp - B), (0, 0)))
    grid = (Bp // tb,)

    full = lambda arr: pl.BlockSpec(arr.shape, lambda i: (0, 0))  # resident weights

    flops = 2 * Bp * (sd + ad) * h2 + 2 * Bp * h2 * 2
    bytes_accessed = 4 * (Bp * (sd + ad) + Bp * 2
                          + w1s.size + w1a.size + b1.size + w2.size + b2.size)

    q = pl.pallas_call(
        _critic_kernel,
        out_shape=jax.ShapeDtypeStruct((Bp, 2), jnp.float32),
        grid=grid,
        in_specs=[
            pl.BlockSpec((tb, sd), lambda i: (i, 0)),          # state tile
            pl.BlockSpec((tb, ad), lambda i: (i, 0)),          # action tile
            full(w1s), full(w1a), full(b1), full(w2), full(b2),
        ],
        out_specs=pl.BlockSpec((tb, 2), lambda i: (i, 0)),
        compiler_params=pltpu.CompilerParams(
            dimension_semantics=("parallel",)),
        cost_estimate=pl.CostEstimate(
            flops=flops, transcendentals=0, bytes_accessed=bytes_accessed),
    )(state, action, w1s, w1a, b1, w2, b2)

    q = q[:B]
    return q[:, 0:1], q[:, 1:2]


def init_qfunction_params(key, state_dim, action_dim, hidden_dim):
    """Deterministic init mirroring nn.Linear default (uniform +- 1/sqrt(fan_in)).
    Weights stored as (in, out); biases as (1, out) for 2-D broadcasting in-kernel."""
    in_dim = state_dim + action_dim
    k1, k2, k3, k4 = jax.random.split(key, 4)
    lim1 = 1.0 / jnp.sqrt(in_dim)
    lim2 = 1.0 / jnp.sqrt(hidden_dim)
    w1 = jax.random.uniform(k1, (in_dim, hidden_dim), jnp.float32, -lim1, lim1)
    b1 = jax.random.uniform(k2, (1, hidden_dim), jnp.float32, -lim1, lim1)
    w2 = jax.random.uniform(k3, (hidden_dim, 1), jnp.float32, -lim2, lim2)
    b2 = jax.random.uniform(k4, (1, 1), jnp.float32, -lim2, lim2)
    return (w1, b1, w2, b2)


def reference_forward(state, action, params):
    """Plain-JAX reference of the PyTorch module for a correctness check."""
    x = jnp.concatenate([state, action], axis=1)
    outs = []
    for (w1, b1, w2, b2) in params:
        h = jnp.maximum(x @ w1 + b1, 0.0)
        outs.append(h @ w2 + b2)
    return tuple(outs)


if __name__ == "__main__":
    # Small shapes consistent with the module's forward.
    B, state_dim, action_dim, hidden_dim = 2, 8, 4, 32

    key = jax.random.PRNGKey(0)
    ks, ka, kq1, kq2 = jax.random.split(key, 4)

    state = jax.random.normal(ks, (B, state_dim), jnp.float32)
    action = jax.random.normal(ka, (B, action_dim), jnp.float32)

    params = (init_qfunction_params(kq1, state_dim, action_dim, hidden_dim),
              init_qfunction_params(kq2, state_dim, action_dim, hidden_dim))
    packed = pack_critic_params(params, state_dim)

    q1, q2 = critic_forward(state, action, packed)
    jax.block_until_ready((q1, q2))

    r1, r2 = reference_forward(state, action, params)
    assert q1.shape == (B, 1) and q2.shape == (B, 1)
    assert jnp.allclose(q1, r1, atol=1e-5), "Q1 mismatch vs reference"
    assert jnp.allclose(q2, r2, atol=1e-5), "Q2 mismatch vs reference"

    print("KERNEL_OK")
</pallas_src>

<mosaic_0001>
module attributes {stable_mosaic.version = 11 : i64} {
  func.func @_critic_kernel(%arg0: i32, %arg1: memref<8x8xf32, #tpu.memory_space<vmem>>, %arg2: memref<8x4xf32, #tpu.memory_space<vmem>>, %arg3: memref<8x64xf32, #tpu.memory_space<vmem>>, %arg4: memref<4x64xf32, #tpu.memory_space<vmem>>, %arg5: memref<1x64xf32, #tpu.memory_space<vmem>>, %arg6: memref<64x2xf32, #tpu.memory_space<vmem>>, %arg7: memref<1x2xf32, #tpu.memory_space<vmem>>, %arg8: memref<8x2xf32, #tpu.memory_space<vmem>>) attributes {dimension_semantics = [#tpu.dimension_semantics<parallel>], iteration_bounds = array<i64: 1>, scalar_prefetch = 0 : i64, scratch_operands = 0 : i64, tpu.core_type = #tpu.core_type<tc>, window_params = [{transform_indices = @transform_0, window_bounds = array<i64: 8, 8>}, {transform_indices = @transform_1, window_bounds = array<i64: 8, 4>}, {pipeline_mode = #tpu.pipeline_mode<synchronous>, transform_indices = @transform_2, window_bounds = array<i64: 8, 64>}, {pipeline_mode = #tpu.pipeline_mode<synchronous>, transform_indices = @transform_3, window_bounds = array<i64: 4, 64>}, {pipeline_mode = #tpu.pipeline_mode<synchronous>, transform_indices = @transform_4, window_bounds = array<i64: 1, 64>}, {pipeline_mode = #tpu.pipeline_mode<synchronous>, transform_indices = @transform_5, window_bounds = array<i64: 64, 2>}, {pipeline_mode = #tpu.pipeline_mode<synchronous>, transform_indices = @transform_6, window_bounds = array<i64: 1, 2>}, {transform_indices = @transform_7, window_bounds = array<i64: 8, 2>}]} {
    %c0 = arith.constant 0 : index
    %c0_0 = arith.constant 0 : index
    %0 = vector.load %arg1[%c0, %c0_0] : memref<8x8xf32, #tpu.memory_space<vmem>>, vector<8x8xf32>
    %c0_1 = arith.constant 0 : index
    %c0_2 = arith.constant 0 : index
    %1 = vector.load %arg3[%c0_1, %c0_2] : memref<8x64xf32, #tpu.memory_space<vmem>>, vector<8x64xf32>
    %cst = arith.constant dense<0.000000e+00> : vector<8x64xf32>
    %2 = tpu.matmul %0, %1, %cst {dimension_numbers = #tpu.dot_dimension_numbers<[1], [0], [0], [1], [0, 0, 1, 1], [], []>} : vector<8x8xf32>, vector<8x64xf32>, vector<8x64xf32> -> vector<8x64xf32>
    %c0_3 = arith.constant 0 : index
    %c0_4 = arith.constant 0 : index
    %3 = vector.load %arg2[%c0_3, %c0_4] : memref<8x4xf32, #tpu.memory_space<vmem>>, vector<8x4xf32>
    %c0_5 = arith.constant 0 : index
    %c0_6 = arith.constant 0 : index
    %4 = vector.load %arg4[%c0_5, %c0_6] : memref<4x64xf32, #tpu.memory_space<vmem>>, vector<4x64xf32>
    %cst_7 = arith.constant dense<0.000000e+00> : vector<8x64xf32>
    %5 = tpu.matmul %3, %4, %cst_7 {dimension_numbers = #tpu.dot_dimension_numbers<[1], [0], [0], [1], [0, 0, 1, 1], [], []>} : vector<8x4xf32>, vector<4x64xf32>, vector<8x64xf32> -> vector<8x64xf32>
    %6 = arith.addf %2, %5 : vector<8x64xf32>
    %c0_8 = arith.constant 0 : index
    %c0_9 = arith.constant 0 : index
    %7 = vector.load %arg5[%c0_8, %c0_9] : memref<1x64xf32, #tpu.memory_space<vmem>>, vector<1x64xf32>
    %8 = vector.broadcast %7 : vector<1x64xf32> to vector<8x64xf32>
    %9 = arith.addf %6, %8 : vector<8x64xf32>
    %cst_10 = arith.constant 0.000000e+00 : f32
    %10 = vector.broadcast %cst_10 : f32 to vector<8x64xf32>
    %11 = arith.maximumf %9, %10 : vector<8x64xf32>
    %c0_11 = arith.constant 0 : index
    %c0_12 = arith.constant 0 : index
    %12 = vector.load %arg6[%c0_11, %c0_12] : memref<64x2xf32, #tpu.memory_space<vmem>>, vector<64x2xf32>
    %cst_13 = arith.constant dense<0.000000e+00> : vector<8x2xf32>
    %13 = tpu.matmul %11, %12, %cst_13 {dimension_numbers = #tpu.dot_dimension_numbers<[1], [0], [0], [1], [0, 0, 1, 1], [], []>} : vector<8x64xf32>, vector<64x2xf32>, vector<8x2xf32> -> vector<8x2xf32>
    %c0_14 = arith.constant 0 : index
    %c0_15 = arith.constant 0 : index
    %14 = vector.load %arg7[%c0_14, %c0_15] : memref<1x2xf32, #tpu.memory_space<vmem>>, vector<1x2xf32>
    %15 = vector.broadcast %14 : vector<1x2xf32> to vector<8x2xf32>
    %16 = arith.addf %13, %15 : vector<8x2xf32>
    %c0_16 = arith.constant 0 : index
    %c0_17 = arith.constant 0 : index
    %17 = vector.load %arg8[%c0_16, %c0_17] : memref<8x2xf32, #tpu.memory_space<vmem>>, vector<8x2xf32>
    tpu.vector_store %arg8[%c0_16, %c0_17], %16 {strides = array<i32>} : memref<8x2xf32, #tpu.memory_space<vmem>>, vector<8x2xf32>,
    return
  }
  func.func @transform_0(%arg0: i32) -> (i32, i32) {
    %c0_i32 = arith.constant 0 : i32
    %c0_i32_0 = arith.constant 0 : i32
    return %arg0, %c0_i32 : i32, i32
  }
  func.func @transform_1(%arg0: i32) -> (i32, i32) {
    %c0_i32 = arith.constant 0 : i32
    %c0_i32_0 = arith.constant 0 : i32
    return %arg0, %c0_i32 : i32, i32
  }
  func.func @transform_2(%arg0: i32) -> (i32, i32) {
    %c0_i32 = arith.constant 0 : i32
    %c0_i32_0 = arith.constant 0 : i32
    %c0_i32_1 = arith.constant 0 : i32
    return %c0_i32, %c0_i32_0 : i32, i32
  }
  func.func @transform_3(%arg0: i32) -> (i32, i32) {
    %c0_i32 = arith.constant 0 : i32
    %c0_i32_0 = arith.constant 0 : i32
    %c0_i32_1 = arith.constant 0 : i32
    return %c0_i32, %c0_i32_0 : i32, i32
  }
  func.func @transform_4(%arg0: i32) -> (i32, i32) {
    %c0_i32 = arith.constant 0 : i32
    %c0_i32_0 = arith.constant 0 : i32
    %c0_i32_1 = arith.constant 0 : i32
    return %c0_i32, %c0_i32_0 : i32, i32
  }
  func.func @transform_5(%arg0: i32) -> (i32, i32) {
    %c0_i32 = arith.constant 0 : i32
    %c0_i32_0 = arith.constant 0 : i32
    %c0_i32_1 = arith.constant 0 : i32
    return %c0_i32, %c0_i32_0 : i32, i32
  }
  func.func @transform_6(%arg0: i32) -> (i32, i32) {
    %c0_i32 = arith.constant 0 : i32
    %c0_i32_0 = arith.constant 0 : i32
    %c0_i32_1 = arith.constant 0 : i32
    return %c0_i32, %c0_i32_0 : i32, i32
  }
  func.func @transform_7(%arg0: i32) -> (i32, i32) {
    %c0_i32 = arith.constant 0 : i32
    %c0_i32_0 = arith.constant 0 : i32
    return %arg0, %c0_i32 : i32, i32
  }
}

</mosaic_0001>

<bundles_post_ra>
// kernel: tpu_custom_call.1
= control target key start
LH: loop header
LB: loop body
LE: loop exit
PB: predicated region body
PF: predicated region fallthrough
CT: control target
= control target key end

     0   :  { %vm34_vm0 = vcmask 1043456   ;;  %vm30_vm1 = vcmask 31744   ;;  %v349_v0 = vmov 0.0   ;;  %vm350_vm2 = vmmov 0   ;;  %s441_s3 = inlined_call_operand.vmem [shape: f32[4,64], index: 3, kind: input, shape index: {}]   ;;  %s442_s1 = inlined_call_operand.vmem [shape: f32[8,4], index: 1, kind: input, shape index: {}]   ;;  %s443_s2 = inlined_call_operand.vmem [shape: f32[8,64], index: 2, kind: input, shape index: {}]   ;;  %s444_s5 = inlined_call_operand.vmem [shape: f32[64,2], index: 5, kind: input, shape index: {}]   ;;  %s445_s0 = inlined_call_operand.vmem [shape: f32[8,8], index: 0, kind: input, shape index: {}]   ;;  %s446_s4 = inlined_call_operand.vmem [shape: f32[1,64], index: 4, kind: input, shape index: {}]   ;;  %s447_s6 = inlined_call_operand.vmem [shape: f32[1,2], index: 6, kind: input, shape index: {}]   ;;  %s448_s7 = inlined_call_operand.vmem [shape: f32[8,2], index: 7, kind: output, shape index: {}]  }
   0x1   :  { %305 = vmatprep.subr.mxu1 %v349_v0  ;;  %v29_v1 = vld [vmem:[%s441_s3] sm:$0xf]  ;;  %307 = vmatprep.mubr.msk.f32.mxu1 %vm350_vm2, %v349_v0  ;;  %v351_v4 = vmov 0.0|0.0   ;;  %v192_v6 = vld [vmem:[%s444_s5 + $0x8] sm:$0xff]  ;;  %vm108_vm3 = vcmask 64512   ;;  %v193_v9 = vld [vmem:[%s444_s5 + $0x10] sm:$0xff] }
   0x2   :  { %v28_v2 = vld [vmem:[%s442_s1] sm:$0xff]  ;;  %306 = vmatpush3.msk.msra.mxu1 %vm34_vm0, %v29_v1  ;;  %334 = vmatprep.subr.bf16.mxu0 %v351_v4  ;;  %v194_v10 = vld [vmem:[%s444_s5 + $0x18] sm:$0xff]  ;;  %v196_v13 = vld [vmem:[%s444_s5 + $0x28] sm:$0xff]  ;;  %vm206_vm4 = vcmask 523264   ;;  %vm280_vm5 = vcmask 15360  }
   0x3   :  { %v27_v3 = vld [vmem:[%s443_s2] sm:$0xff]  ;;  %308 = vmatmul.mubr.msk.f32.vlgmr.msra.gmra.mrb[0].mxu1 %vm30_vm1, %v28_v2  ;;  %310 = vmatprep.subr.mxu1 %v349_v0  ;;  %v338_v11 = vpack.c.bf16 %v194_v10, %v193_v9  ;;  %v197_v15 = vld [vmem:[%s444_s5 + $0x30] sm:$0xff]  ;;  %v198_v16 = vld [vmem:[%s444_s5 + $0x38] sm:$0xff] }
   0x4   :  { %v191_v5 = vld [vmem:[%s444_s5] sm:$0xff]  ;;  %311 = vmatpush3.msra.mxu1 %v27_v3  ;;  %312 = vmatprep.mubr.msk.f32.mxu1 %vm350_vm2, %v349_v0  ;;  %v344_v17 = vpack.c.bf16 %v198_v16, %v197_v15 }
   0x5   :  { %v335_v7 = vpack.c.bf16 %v192_v6, %v191_v5  ;;  %v26_v8 = vld [vmem:[%s445_s0] sm:$0xff]  ;;  %331 = vmatprep.mubr.msk.f32.mxu0 %vm350_vm2, %v349_v0 }
   0x6   :  { %v195_v12 = vld [vmem:[%s444_s5 + $0x20] sm:$0xff] }
   0x7   :  { %336 = vmatpush3.bf16.msra.mxu0 %v335_v7  ;;  %313 = vmatmul.mubr.msk.f32.vlgmr.msra.gmra.mrb[2].mxu1 %vm108_vm3, %v26_v8  ;;  %v341_v14 = vpack.c.bf16 %v196_v13, %v195_v12  ;;  %v289_v21 = vld [vmem:[%s446_s4] ss:$0 sm:$0xff] }
   0x8   :  { %337 = vmatprep.subr.bf16.mxu0 %v351_v4  ;;  %v290_v26 = vld [vmem:[%s447_s6] ss:$0 sm:$0xff] }
   0xb   :  { %339 = vmatpush3.bf16.msra.mxu0 %v338_v11 }
   0xc   :  { %340 = vmatprep.subr.bf16.mxu0 %v351_v4 }
   0xf   :  { %342 = vmatpush3.bf16.msra.mxu0 %v341_v14 }
  0x10   :  { %343 = vmatprep.subr.bf16.mxu0 %v351_v4 }
  0x13   :  { %345 = vmatpush3.bf16.msra.mxu0 %v344_v17 }
  0xd6   :  { %v104_v18 = vpop.f32.mrb[0].mxu1 }
  0xd7   :  { %v309_v19 = vpop.f32.mrb[1].mxu1 }
  0xda   :  { %v178_v20 = vpop.f32.mrb[2].mxu1 }
  0xdb   :  { %v179_v22 = vadd.f32 %v178_v20, %v104_v18  ;;  %v314_v23 = vpop.f32.mrb[3].mxu1 }
  0xdd   :  { %v189_v24 = vadd.f32 %v289_v21, %v179_v22 }
  0xdf   :  { %v190_v25 = vmax.f32 %v189_v24, 0.0 }
  0xe1   :  { %332 = vmatmul.mubr.msk.f32.vlgmr.msra.gmra.mrb[0].mxu0 %vm206_vm4, %v190_v25 }
 0x1b4   :  { %v276_v27 = vpop.f32.mrb[0].mxu0 }
 0x1b5   :  { %v277_v28 = vadd.f32 %v290_v26, %v276_v27  ;;  %v333_v29 = vpop.f32.mrb[1].mxu0 }
 0x1b7   :  { %281 = vst.msk [vmem:[%s448_s7] sm:$0xff] %vm280_vm5, %v277_v28 }

</bundles_post_ra>
